<compile_context>
chip_gen: v7x
topology: tpu7x:2x2x1
jax: 0.10.0
libtpu: 0.0.40
codegen_flags: <defaults>
</compile_context>

<pallas_src>
import jax
import jax.numpy as jnp
from jax.experimental import pallas as pl
from jax.experimental.pallas import tpu as pltpu


def _round_up(x: int, m: int) -> int:
    return ((x + m - 1) // m) * m


def _pick_tile(desired: int, dim: int, align: int) -> int:
    """Largest multiple of `align` <= desired that divides `dim` (dim % align == 0)."""
    t = max(align, (min(desired, dim) // align) * align)
    while dim % t:
        t -= align
    return t


def dense_block_kernel(x_ref, w_ref, b_ref, o_ref):
    # grid = (batch_tiles, n_out_tiles, n_in_tiles); reduction axis (k) last.
    k = pl.program_id(2)

    @pl.when(k == 0)
    def _init():
        # Seed the resident f32 output tile with the bias (broadcast over the
        # batch tile); the k-steps then accumulate straight into o_ref, so no
        # separate scratch accumulator and no finalize copy are needed.
        o_ref[...] = jnp.broadcast_to(b_ref[...], o_ref.shape)

    # x arrives as bf16 (halved DMA); tanh runs in f32 on the EUP slot, the
    # activation is cast back to bf16 so the MXU runs bf16 x bf16 with f32
    # accumulation (weight tile is already bf16).
    act = jnp.tanh(x_ref[...].astype(jnp.float32)).astype(jnp.bfloat16)
    o_ref[...] += jnp.dot(act, w_ref[...], preferred_element_type=jnp.float32)


def prepare_dense_params(weight, bias, *, pad_k: int = 512, pad_n: int = 512):
    """One-time parameter prep (init-time, NOT per forward call).

    PyTorch (n_out, n_in) weight -> transposed, bf16, zero-padded (K_p, N_p);
    bias -> f32, zero-padded (1, N_p).  Doing the padding here removes an
    entire extra HBM pass over the weight from every forward call.
    """
    w_t = jnp.asarray(weight).T.astype(jnp.bfloat16)          # (n_in, n_out)
    n_in, n_out = w_t.shape
    K_p = _round_up(n_in, pad_k)
    N_p = _round_up(n_out, pad_n)
    w_p = jnp.pad(w_t, ((0, K_p - n_in), (0, N_p - n_out)))
    b_p = jnp.pad(jnp.asarray(bias, dtype=jnp.float32).reshape(1, n_out),
                  ((0, 0), (0, N_p - n_out)))
    return {"w": w_p, "b": b_p, "n_in": n_in, "n_out": n_out}


def dense_block_forward(x, params, *, tile_b=None, tile_n=None, tile_k=None):
    """y = tanh(x) @ W.T + b  with pre-prepared params (see prepare_dense_params)."""
    w_p, b_p = params["w"], params["b"]
    n_in, n_out = params["n_in"], params["n_out"]
    B, n_in_x = x.shape
    assert n_in_x == n_in, "weight / input feature mismatch"
    K_p, N_p = w_p.shape

    # ---- tile selection --------------------------------------------------
    # Big output tiles are the main lever in this HBM-bound kernel: doubling
    # tile_n halves x re-reads, doubling tile_b halves weight re-reads, and
    # fewer grid steps amortize the ~0.35us/step overhead.  tile_k only sets
    # per-step size, not reuse.
    B_align = 16                      # bf16 sublane packing for x (also ok for f32 out)
    B_ceil = _round_up(B, B_align)

    if tile_b is None:
        tile_b = 1024 if B_ceil >= 2 * 1024 else 512
    tile_b = max(B_align, _round_up(min(tile_b, B_ceil), B_align))

    if tile_n is None:
        tile_n = 1024 if (N_p % 1024 == 0 and N_p >= 2 * 1024) else 512
    tile_n = _pick_tile(tile_n, N_p, 128)

    if tile_k is None:
        tile_k = 512
    tile_k = _pick_tile(tile_k, K_p, 128)

    B_p = _round_up(B, tile_b)

    # Keep >=2 blocks on a parallel grid axis where possible so both v7x
    # TensorCores get work (one extra grid step is harmless on v5e/v6e).
    if B_p // tile_b == 1 and N_p // tile_n == 1:
        if tile_n >= 256 and N_p % (tile_n // 2) == 0:
            tile_n //= 2
        elif tile_b >= 2 * B_align:
            tile_b = max(B_align, _round_up(tile_b // 2, B_align))
            B_p = _round_up(B, tile_b)

    # ---- per-generation VMEM budget ---------------------------------------
    try:
        vmem_cap = pltpu.get_tpu_info().vmem_capacity_bytes
    except Exception:  # fall back to the smallest per-TC VMEM (v7x)
        vmem_cap = 64 << 20
    vmem_limit = int(vmem_cap * 0.80)   # headroom for Mosaic scratch / semaphores

    def _vmem_needed(tb, tn, tk):
        per_step = (tb * tk * 2       # bf16 x tile
                    + tk * tn * 2     # bf16 weight tile
                    + tn * 4          # f32 bias row
                    + tb * tn * 4)    # f32 output tile (doubles as accumulator)
        return 2 * per_step + (2 << 20)   # double-buffering + margin (no double count)

    while _vmem_needed(tile_b, tile_n, tile_k) > vmem_limit and tile_b > B_align:
        tile_b = max(B_align, _round_up(tile_b // 2, B_align))
        B_p = _round_up(B, tile_b)

    # ---- input padding + bf16 activation I/O -------------------------------
    # Zero padding is numerically inert: tanh(0)=0 and padded weight/bias
    # entries are 0.  The pad and the bf16 cast fuse into one XLA pass; bf16
    # halves the dominant (and N_p/tile_n times re-read) x DMA.
    x_p = x
    if (B_p, K_p) != (B, n_in):
        x_p = jnp.pad(x_p, ((0, B_p - B), (0, K_p - n_in)))
    x_p = x_p.astype(jnp.bfloat16)

    grid = (B_p // tile_b, N_p // tile_n, K_p // tile_k)

    out_p = pl.pallas_call(
        dense_block_kernel,
        out_shape=jax.ShapeDtypeStruct((B_p, N_p), jnp.float32),
        grid_spec=pltpu.PrefetchScalarGridSpec(
            num_scalar_prefetch=0,
            grid=grid,
            in_specs=[
                pl.BlockSpec((tile_b, tile_k), lambda i, j, k: (i, k)),  # x (bf16)
                pl.BlockSpec((tile_k, tile_n), lambda i, j, k: (k, j)),  # w_t (bf16)
                pl.BlockSpec((1, tile_n), lambda i, j, k: (0, j)),       # bias (f32)
            ],
            out_specs=pl.BlockSpec((tile_b, tile_n), lambda i, j, k: (i, j)),
        ),
        compiler_params=pltpu.CompilerParams(
            dimension_semantics=("parallel", "parallel", "arbitrary"),
            vmem_limit_bytes=int(vmem_limit),
        ),
    )(x_p, w_p, b_p)

    if (B_p, N_p) != (B, n_out):
        out_p = out_p[:B, :n_out]
    return out_p


def _run_case(key, B, n_in, n_out, w_scale):
    kx, kw, kb = jax.random.split(key, 3)
    x = jax.random.normal(kx, (B, n_in), dtype=jnp.float32)
    weight = jax.random.normal(kw, (n_out, n_in), dtype=jnp.float32) * w_scale
    bias = jax.random.normal(kb, (n_out,), dtype=jnp.float32) * 0.1

    params = prepare_dense_params(weight, bias)
    out = jax.block_until_ready(dense_block_forward(x, params))

    # Pure-JAX f32 reference; tolerance loosened for bf16 MXU operands
    # (accumulation stays f32 inside the kernel).
    ref = jnp.tanh(x) @ weight.T + bias
    assert out.shape == (B, n_out)
    assert jnp.allclose(out, ref, atol=3e-2, rtol=3e-2), \
        f"mismatch vs reference for shape ({B},{n_in})->({n_out})"


if __name__ == "__main__":
    key = jax.random.PRNGKey(0)
    k1, k2 = jax.random.split(key)

    # Small, deliberately un-aligned shapes (exercises padding + tiny tiles).
    _run_case(k1, B=24, n_in=48, n_out=40, w_scale=0.1)

    # Module-default feature sizes (784 -> padded 1024): exercises a 2-step
    # K reduction and a 2-block parallel n_out axis.
    _run_case(k2, B=64, n_in=784, n_out=784, w_scale=0.05)

    print("KERNEL_OK")
</pallas_src>

<mosaic_0001>
module attributes {stable_mosaic.version = 11 : i64} {
  func.func @dense_block_kernel(%arg0: i32, %arg1: i32, %arg2: i32, %arg3: memref<32x512xbf16, #tpu.memory_space<vmem>>, %arg4: memref<512x256xbf16, #tpu.memory_space<vmem>>, %arg5: memref<1x256xf32, #tpu.memory_space<vmem>>, %arg6: memref<32x256xf32, #tpu.memory_space<vmem>>) attributes {dimension_semantics = [#tpu.dimension_semantics<parallel>, #tpu.dimension_semantics<parallel>, #tpu.dimension_semantics<arbitrary>], iteration_bounds = array<i64: 1, 2, 1>, scalar_prefetch = 0 : i64, scratch_operands = 0 : i64, tpu.core_type = #tpu.core_type<tc>, window_params = [{transform_indices = @transform_0, window_bounds = array<i64: 32, 512>}, {transform_indices = @transform_1, window_bounds = array<i64: 512, 256>}, {transform_indices = @transform_2, window_bounds = array<i64: 1, 256>}, {transform_indices = @transform_3, window_bounds = array<i64: 32, 256>}]} {
    %c0_i32 = arith.constant 0 : i32
    %0 = arith.cmpi eq, %arg2, %c0_i32 : i32
    %1 = arith.extui %0 : i1 to i32
    %c0_i32_0 = arith.constant 0 : i32
    %2 = arith.cmpi ne, %1, %c0_i32_0 : i32
    scf.if %2 {
      %c0_8 = arith.constant 0 : index
      %c0_9 = arith.constant 0 : index
      %12 = vector.load %arg5[%c0_8, %c0_9] : memref<1x256xf32, #tpu.memory_space<vmem>>, vector<1x256xf32>
      %13 = vector.shape_cast %12 : vector<1x256xf32> to vector<1x256xf32>
      %14 = vector.broadcast %13 : vector<1x256xf32> to vector<32x256xf32>
      %c0_10 = arith.constant 0 : index
      %c0_11 = arith.constant 0 : index
      %15 = vector.load %arg6[%c0_10, %c0_11] : memref<32x256xf32, #tpu.memory_space<vmem>>, vector<32x256xf32>
      tpu.vector_store %arg6[%c0_10, %c0_11], %14 {strides = array<i32>} : memref<32x256xf32, #tpu.memory_space<vmem>>, vector<32x256xf32>,
    } else {
    }
    %c0 = arith.constant 0 : index
    %c0_1 = arith.constant 0 : index
    %3 = vector.load %arg3[%c0, %c0_1] : memref<32x512xbf16, #tpu.memory_space<vmem>>, vector<32x512xbf16>
    %4 = arith.extf %3 : vector<32x512xbf16> to vector<32x512xf32>
    %5 = math.tanh %4 : vector<32x512xf32>
    %6 = arith.truncf %5 : vector<32x512xf32> to vector<32x512xbf16>
    %c0_2 = arith.constant 0 : index
    %c0_3 = arith.constant 0 : index
    %7 = vector.load %arg6[%c0_2, %c0_3] : memref<32x256xf32, #tpu.memory_space<vmem>>, vector<32x256xf32>
    %c0_4 = arith.constant 0 : index
    %c0_5 = arith.constant 0 : index
    %8 = vector.load %arg4[%c0_4, %c0_5] : memref<512x256xbf16, #tpu.memory_space<vmem>>, vector<512x256xbf16>
    %cst = arith.constant dense<0.000000e+00> : vector<32x256xf32>
    %9 = tpu.matmul %6, %8, %cst {dimension_numbers = #tpu.dot_dimension_numbers<[1], [0], [0], [1], [0, 0, 1, 1], [], []>} : vector<32x512xbf16>, vector<512x256xbf16>, vector<32x256xf32> -> vector<32x256xf32>
    %10 = arith.addf %7, %9 : vector<32x256xf32>
    %c0_6 = arith.constant 0 : index
    %c0_7 = arith.constant 0 : index
    %11 = vector.load %arg6[%c0_6, %c0_7] : memref<32x256xf32, #tpu.memory_space<vmem>>, vector<32x256xf32>
    tpu.vector_store %arg6[%c0_6, %c0_7], %10 {strides = array<i32>} : memref<32x256xf32, #tpu.memory_space<vmem>>, vector<32x256xf32>,
    return
  }
  func.func @transform_0(%arg0: i32, %arg1: i32, %arg2: i32) -> (i32, i32) {
    %c0_i32 = arith.constant 0 : i32
    return %arg0, %arg2 : i32, i32
  }
  func.func @transform_1(%arg0: i32, %arg1: i32, %arg2: i32) -> (i32, i32) {
    %c0_i32 = arith.constant 0 : i32
    return %arg2, %arg1 : i32, i32
  }
  func.func @transform_2(%arg0: i32, %arg1: i32, %arg2: i32) -> (i32, i32) {
    %c0_i32 = arith.constant 0 : i32
    %c0_i32_0 = arith.constant 0 : i32
    return %c0_i32, %arg1 : i32, i32
  }
  func.func @transform_3(%arg0: i32, %arg1: i32, %arg2: i32) -> (i32, i32) {
    %c0_i32 = arith.constant 0 : i32
    return %arg0, %arg1 : i32, i32
  }
}

</mosaic_0001>

<bundles_post_ra>
// kernel: tpu_custom_call.1
= control target key start
LH: loop header
LB: loop body
LE: loop exit
PB: predicated region body
PF: predicated region fallthrough
CT: control target
= control target key end

     0   :  { %8 = vsyncpa [#allocation3], 0  ;;  %s1757_s0 = inlined_call_operand.hbm [shape: bf16[32,512], index: 0, kind: input, shape index: {}]   ;;  %s1758_s1 = inlined_call_operand.hbm [shape: bf16[512,512], index: 1, kind: input, shape index: {}]   ;;  %s1759_s2 = inlined_call_operand.vmem [shape: f32[1,512], index: 2, kind: input, shape index: {}]   ;;  %s1760_s3 = inlined_call_operand.hbm [shape: f32[32,512], index: 3, kind: output, shape index: {}]  }
   0x1   :  { %9 = vsyncpa [#allocation6], 0 }
   0x2   :  { %11 = vsyncpa [#allocation6 + $0x1], 0 }
   0x3   :  { %12 = vsyncpa [#allocation4], 0 }
   0x4   :  { %14 = vsyncpa [#allocation4 + $0x1], 0  ;;  %s1463_s12 = smov 0   ;;  %s1465_s13 = smov 0  }
   0x5   :  { %s1467_s14 = smov 0   ;;  %s1469_s15 = smov 0  }
   0x6   :  { %s1471_s16 = smov 0   ;;  %s1473_s17 = smov 0  }
   0x7 LB: > { %s987_s18 = sadd.s32 4294967295, %s1431_s17   ;;  %s988_s19 = sadd.s32 4294967294, %s1431_s17   ;;  %s1431_s17 = sphi %s1473_s17, %s20_s17   ;;  %s1427_s16 = sphi %s1471_s16, %s1786_s16   ;;  %s1423_s15 = sphi %s1469_s15, %s1785_s15   ;;  %s1419_s14 = sphi %s1467_s14, %s1784_s14   ;;  %s1415_s13 = sphi %s1465_s13, %s1783_s13   ;;  %s1411_s12 = sphi %s1463_s12, %s1782_s12  }
   0x8   : > { %p83_p0 = scmp.ne.s32.totalorder %s1419_s14, %s1415_s13  ;;  %p84_p1 = scmp.eq.s32.totalorder %s1431_s17, 0 }
   0x9   : > { %p89_p2 = scmp.ne.s32.totalorder %s1415_s13, %s1411_s12  ;;  %p1500_p3 = scmp.eq.s32.totalorder %s987_s18, 0 }
   0xa   : > { %p1504_p4 = por %p84_p1, %p83_p0  ;;  %p141_p5 = scmp.eq.s32.totalorder %s987_s18, 1 }
   0xb   : > { %s1767_s20 = scalar_select %p1500_p3, 1, 0 }
   0xc   : > { %p1510_p6 = por %p1500_p3, %p89_p2  ;;  %p147_p7 = scmp.eq.s32.totalorder %s988_s19, 1 }
   0xd   : > { %p1514_p8 = por %p141_p5, %p83_p0  ;;  %p989_p9 = scmp.ge.s32.totalorder %s1431_s17, 1 }
   0xe   : > { %s1769_s22 = scalar_select %p1510_p6, 1, 0 }
   0xf   : > { %s1770_s23 = scalar_select %p1514_p8, 1, 0 }
  0x10   : > { %p1519_p10 = por %p147_p7, %p89_p2  ;;  %p154_p11 = scmp.lt.s32.totalorder %s1431_s17, 3 }
  0x11   : > { %s1433_s26 = smov [#allocation2]   ;;  %p1100_p1 = scmp.lt.s32.totalorder %s1431_s17, 2 }
  0x12   : > { %s1771_s24 = scalar_select %p1519_p10, 1, 0 }
  0x13   : > { %p1524_p12 = pnand %p989_p9, %p154_p11  ;;  %s172_s27 = sshll.u32 %s1433_s26, 4  ;;  %s1528_s27 = int_to_ptr.vmem [resolvable:$true] %s172_s27 }
  0x14   : > { %p1542_p2 = pnand %p1100_p1, %p1504_p4  ;;  %s35_s30 = sadd.s32 1, %s1427_s16 }
  0x15   : > { %s1772_s25 = scalar_select %p1524_p12, 1, 0 }
  0x16   : > { %p1087_p13 = pneg %p1524_p12  ;;  %s1287_s6 = scalar_lea.hbm %s1757_s0, 1024 }
  0x17   : > { %s1774_s29 = scalar_select %p1542_p2, 1, 0 }
  0x18   : > { %p1536_p5 = pnand %p1087_p13, %p1500_p3  ;;  %p1288_p7 = scmp.ne.s32.totalorder %s1757_s0, %s1287_s6 }
  0x19   : > { %p1294_p4 = scmp.lt.u32.totalorder %s1287_s6, %s1757_s0 }
  0x1a   : > { %p1289_p9 = pneg %p1536_p5 }
  0x1c   : > { %p1290_p11 = pnand %p1289_p9, %p1288_p7 }
  0x1e   : > { %p1291_p13 = pneg %p1290_p11 }
  0x20   : > { %p1296_p1 = pnand %p1294_p4, %p1291_p13 }
  0x22   : > { %1299 = shalt.err (!%p1296_p1)
}
  0x23   : > { %s1300_s11 = scalar_lea.vmem %s1528_s27, 1024  ;;  %p1308_p6 = scmp.lt.s32.totalorder %s1528_s27, %s1528_s27 }
  0x24   : > { %p1301_p0 = scmp.ne.s32.totalorder %s1528_s27, %s1300_s11  ;;  %p1309_p3 = scmp.lt.s32.totalorder %s1300_s11, %s1300_s11 }
  0x26   : > { %p1303_p10 = pnand %p1301_p0, %p1289_p9  ;;  %p1310_p12 = por %p1309_p3, %p1308_p6 }
  0x28   : > { %p1304_p8 = pneg %p1303_p10 }
  0x2a   : > { %p1311_p2 = pnand %p1310_p12, %p1304_p8 }
  0x2c   : > { %1314 = shalt.err (!%p1311_p2)
}
  0x2d   : > { %s1434_s18 = smov 256   ;;  %s1435_s19 = smov 16  }
  0x2e   : > { %1090 = dma.hbm_to_vmem [thread:$0]  (!%p1536_p5), %s1757_s0, 1024, %s1528_s27, [#allocation3], %s1434_s18, %s1434_s18, %s1435_s19  }
  0x2f   : > { %p37_p10 = scmp.ge.s32.totalorder %s35_s30, 2  ;;  %s76_s4 = sadd.s32 1, %s1419_s14 }
  0x30   : > { %s186_s5 = sand.u32 1, %s1419_s14   ;;  %s1069_s8 = sshll.u32 %s1427_s16, 7 }
  0x31   : > { %s1788_s30 = smov (%p37_p10, %s35_s30), 0  ;;  %s992_s6 = sshll.u32 %s186_s5, 9 }
  0x32   : > { %s72_s7 = ssub.s32 %s1427_s16, %s1788_s30  ;;  %s1580_s10 = scalar_lea.hbm %s1758_s1, %s1069_s8 }
  0x33   : > { %p74_p3 = scmp.eq.s32.totalorder %s72_s7, 0  ;;  %s190_s27 = scalar_lea.vmem [#allocation5], %s992_s6 }
  0x34   : > { %s200_s11 = sshll.u32 %s190_s27, 4  ;;  %s1587_s21 = scalar_lea.sflag [#allocation6], %s186_s5  ;;  %s1585_s11 = int_to_ptr.vmem [resolvable:$true] %s200_s11 }
  0x35   : > { %s1583_s19 = scalar_select %p74_p3, %s1419_s14, %s76_s4  }
  0x36   : > { %s1315_s26 = scalar_lea.hbm %s1580_s10, 8192  ;;  %p1775_p8 = scmp.ne.s32.totalorder %s1774_s29, 0 }
  0x37   : > { %p1316_p6 = scmp.ne.s32.totalorder %s1580_s10, %s1315_s26  ;;  %s1320_s9 = scalar_lea.hbm %s1758_s1, 16384 }
  0x38   : > { %p1317_p12 = pneg %p1775_p8  ;;  %p1321_p2 = scmp.lt.u32.totalorder %s1580_s10, %s1758_s1 }
  0x39   : > { %p1322_p7 = scmp.lt.u32.totalorder %s1320_s9, %s1315_s26  ;;  %p1324_p11 = scmp.lt.u32.totalorder %s1315_s26, %s1580_s10 }
  0x3a   : > { %p1318_p0 = pnand %p1317_p12, %p1316_p6 }
  0x3b   : > { %p1323_p9 = por %p1322_p7, %p1321_p2 }
  0x3c   : > { %p1319_p5 = pneg %p1318_p0 }
  0x3d   : > { %p1325_p13 = por %p1324_p11, %p1323_p9 }
  0x3f   : > { %p1326_p4 = pnand %p1325_p13, %p1319_p5 }
  0x41   : > { %1329 = shalt.err (!%p1326_p4)
}
  0x42   : > { %s1330_s4 = scalar_lea.vmem %s1585_s11, 8192  ;;  %s1436_s5 = smov [#allocation5]  }
  0x43   : > { %p1331_p1 = scmp.ne.s32.totalorder %s1585_s11, %s1330_s4  ;;  %s1335_s27 = sshll.u32 %s1436_s5, 4  ;;  %s1336_s27 = int_to_ptr.vmem [resolvable:$false] %s1335_s27 }
  0x44   : > { %s1337_s7 = scalar_lea.vmem %s1336_s27, 16384  ;;  %p1338_p6 = scmp.lt.s32.totalorder %s1585_s11, %s1336_s27 }
  0x45   : > { %p1333_p10 = pnand %p1331_p1, %p1317_p12  ;;  %p1339_p0 = scmp.lt.s32.totalorder %s1337_s7, %s1330_s4 }
  0x47   : > { %p1334_p3 = pneg %p1333_p10  ;;  %p1340_p2 = por %p1339_p0, %p1338_p6 }
  0x49   : > { %p1341_p7 = pnand %p1340_p2, %p1334_p3 }
  0x4b   : > { %1344 = shalt.err (!%p1341_p7)
}
  0x4c   : > { %s1437_s26 = smov 128   ;;  %s1438_s8 = smov 8  }
  0x4d   : > { %1094 = dma.hbm_to_vmem [thread:$0]  (!%p1775_p8), %s1580_s10, 8192, %s1585_s11, %s1587_s21, %s1434_s18, %s1437_s26, %s1438_s8  }
  0x4e   : > { %p1776_p12 = scmp.ne.s32.totalorder %s1772_s25, 0 }
  0x4f   : > { %p1777_p5 = scmp.ne.s32.totalorder (!%p1776_p12), %s1767_s20, 0 }
  0x50   : > { %220 = sbr.rel (%p1776_p12) target bundleno = 401 (0x191), region = 32 }
  0x57   : > { %1398 = dma.done.wait (%p1777_p5), [#allocation3], 1024  }
  0x58   : > { %1400 = vsyncadd (%p1777_p5), [#allocation3], 4294966272  ;;  %s1623_s9 = sand.u32 1, %s1415_s13   ;;  %p1778_p8 = scmp.ne.s32.totalorder %s1769_s22, 0 }
  0x59   : > { %s997_s6 = sshll.u32 %s1623_s9, 9  ;;  %s227_s28 = scalar_lea.sflag [#allocation6], %s1623_s9 }
  0x5a   : > { %s1627_s29 = scalar_lea.vmem [#allocation5], %s997_s6 }
  0x5b   : > { %1402 = dma.done.wait (%p1778_p8), %s227_s28, 8192  }
  0x5c   : > { %1404 = vsyncadd (%p1778_p8), %s227_s28, 4294959104  ;;  %v1159_v0 = vld [vmem:[%s1627_s29 + $0x4] ss:$8 sps:$4 sm:$0xff]   ;;  %v1163_v2 = vld [vmem:[%s1627_s29] ss:$8 sps:$4 sm:$0xff]   ;;  %s999_s20 = sshll.u32 %s1423_s15, 1 }
  0x5d   : > { %v1161_v1 = vld [vmem:[%s1627_s29 + $0x104] ss:$8 sps:$4 sm:$0xff]   ;;  %732 = vmatprep.subr.bf16.mxu1 %v1159_v0  ;;  %v1164_v3 = vld [vmem:[%s1627_s29 + $0x100] ss:$8 sps:$4 sm:$0xff]   ;;  %v1165_v4 = vld [vmem:[%s1627_s29 + $0x14] ss:$8 sps:$4 sm:$0xff]  }
  0x5e   : > { %785 = vmatprep.subr.bf16.mxu0 %v1161_v1  ;;  %733 = vmatpush1.bf16.msra.mxu1 %v1163_v2  ;;  %v1167_v5 = vld [vmem:[%s1627_s29 + $0x114] ss:$8 sps:$4 sm:$0xff]   ;;  %v1169_v6 = vld [vmem:[%s1627_s29 + $0x10] ss:$8 sps:$4 sm:$0xff]   ;;  %v1171_v8 = vld [vmem:[%s1627_s29 + $0x24] ss:$8 sps:$4 sm:$0xff]  }
  0x5f   : > { %786 = vmatpush1.bf16.msra.mxu0 %v1164_v3  ;;  %734 = vmatprep.subr.bf16.mxu1 %v1165_v4  ;;  %v1170_v7 = vld [vmem:[%s1627_s29 + $0x110] ss:$8 sps:$4 sm:$0xff]   ;;  %v1173_v9 = vld [vmem:[%s1627_s29 + $0x124] ss:$8 sps:$4 sm:$0xff]   ;;  %v1175_v10 = vld [vmem:[%s1627_s29 + $0x20] ss:$8 sps:$4 sm:$0xff]  }
  0x60   : > { %787 = vmatprep.subr.bf16.mxu0 %v1167_v5  ;;  %v1176_v11 = vld [vmem:[%s1627_s29 + $0x120] ss:$8 sps:$4 sm:$0xff]   ;;  %v1177_v12 = vld [vmem:[%s1627_s29 + $0x34] ss:$8 sps:$4 sm:$0xff]   ;;  %v1181_v14 = vld [vmem:[%s1627_s29 + $0x30] ss:$8 sps:$4 sm:$0xff]  }
  0x61   : > { %v1179_v13 = vld [vmem:[%s1627_s29 + $0x134] ss:$8 sps:$4 sm:$0xff]   ;;  %v1182_v15 = vld [vmem:[%s1627_s29 + $0x130] ss:$8 sps:$4 sm:$0xff]   ;;  %v1183_v16 = vld [vmem:[%s1627_s29 + $0x44] ss:$8 sps:$4 sm:$0xff]  }
  0x62   : > { %735 = vmatpush1.bf16.msra.mxu1 %v1169_v6  ;;  %v1185_v17 = vld [vmem:[%s1627_s29 + $0x144] ss:$8 sps:$4 sm:$0xff]   ;;  %v1187_v18 = vld [vmem:[%s1627_s29 + $0x40] ss:$8 sps:$4 sm:$0xff]   ;;  %v1189_v20 = vld [vmem:[%s1627_s29 + $0x54] ss:$8 sps:$4 sm:$0xff]  }
  0x63   : > { %788 = vmatpush1.bf16.msra.mxu0 %v1170_v7  ;;  %736 = vmatprep.subr.bf16.mxu1 %v1171_v8  ;;  %v1188_v19 = vld [vmem:[%s1627_s29 + $0x140] ss:$8 sps:$4 sm:$0xff]   ;;  %v1191_v21 = vld [vmem:[%s1627_s29 + $0x154] ss:$8 sps:$4 sm:$0xff]   ;;  %v1193_v22 = vld [vmem:[%s1627_s29 + $0x50] ss:$8 sps:$4 sm:$0xff]  }
  0x64   : > { %789 = vmatprep.subr.bf16.mxu0 %v1173_v9  ;;  %v1194_v23 = vld [vmem:[%s1627_s29 + $0x150] ss:$8 sps:$4 sm:$0xff]   ;;  %v1195_v24 = vld [vmem:[%s1627_s29 + $0x64] ss:$8 sps:$4 sm:$0xff]   ;;  %v1199_v26 = vld [vmem:[%s1627_s29 + $0x60] ss:$8 sps:$4 sm:$0xff]  }
  0x65   : > { %v1197_v25 = vld [vmem:[%s1627_s29 + $0x164] ss:$8 sps:$4 sm:$0xff]   ;;  %v1200_v27 = vld [vmem:[%s1627_s29 + $0x160] ss:$8 sps:$4 sm:$0xff]   ;;  %v1201_v28 = vld [vmem:[%s1627_s29 + $0x74] ss:$8 sps:$4 sm:$0xff]  }
  0x66   : > { %737 = vmatpush1.bf16.msra.mxu1 %v1175_v10  ;;  %v1203_v29 = vld [vmem:[%s1627_s29 + $0x174] ss:$8 sps:$4 sm:$0xff]   ;;  %v1205_v30 = vld [vmem:[%s1627_s29 + $0x70] ss:$8 sps:$4 sm:$0xff]   ;;  %v1207_v32 = vld [vmem:[%s1627_s29 + $0x84] ss:$8 sps:$4 sm:$0xff]  }
  0x67   : > { %790 = vmatpush1.bf16.msra.mxu0 %v1176_v11  ;;  %738 = vmatprep.subr.bf16.mxu1 %v1177_v12  ;;  %v1206_v31 = vld [vmem:[%s1627_s29 + $0x170] ss:$8 sps:$4 sm:$0xff]   ;;  %v1209_v33 = vld [vmem:[%s1627_s29 + $0x184] ss:$8 sps:$4 sm:$0xff]   ;;  %v1211_v34 = vld [vmem:[%s1627_s29 + $0x80] ss:$8 sps:$4 sm:$0xff]  }
  0x68   : > { %791 = vmatprep.subr.bf16.mxu0 %v1179_v13  ;;  %v1212_v35 = vld [vmem:[%s1627_s29 + $0x180] ss:$8 sps:$4 sm:$0xff]   ;;  %v1213_v36 = vld [vmem:[%s1627_s29 + $0x94] ss:$8 sps:$4 sm:$0xff]   ;;  %v1217_v38 = vld [vmem:[%s1627_s29 + $0x90] ss:$8 sps:$4 sm:$0xff]  }
  0x69   : > { %v1215_v37 = vld [vmem:[%s1627_s29 + $0x194] ss:$8 sps:$4 sm:$0xff]   ;;  %v1218_v39 = vld [vmem:[%s1627_s29 + $0x190] ss:$8 sps:$4 sm:$0xff]   ;;  %v1219_v40 = vld [vmem:[%s1627_s29 + $0xa4] ss:$8 sps:$4 sm:$0xff]  }
  0x6a   : > { %739 = vmatpush1.bf16.msra.mxu1 %v1181_v14  ;;  %v1221_v41 = vld [vmem:[%s1627_s29 + $0x1a4] ss:$8 sps:$4 sm:$0xff]   ;;  %v1223_v42 = vld [vmem:[%s1627_s29 + $0xa0] ss:$8 sps:$4 sm:$0xff]   ;;  %v1225_v44 = vld [vmem:[%s1627_s29 + $0xb4] ss:$8 sps:$4 sm:$0xff]  }
  0x6b   : > { %792 = vmatpush1.bf16.msra.mxu0 %v1182_v15  ;;  %740 = vmatprep.subr.bf16.mxu1 %v1183_v16  ;;  %v1224_v43 = vld [vmem:[%s1627_s29 + $0x1a0] ss:$8 sps:$4 sm:$0xff]   ;;  %v1227_v45 = vld [vmem:[%s1627_s29 + $0x1b4] ss:$8 sps:$4 sm:$0xff]   ;;  %v1229_v51 = vld [vmem:[%s1627_s29 + $0xb0] ss:$8 sps:$4 sm:$0xff]  }
  0x6c   : > { %793 = vmatprep.subr.bf16.mxu0 %v1185_v17  ;;  %v292_v46 = vld [vmem:[#allocation2] sm:$0xff]  ;;  %v294_v47 = vld [vmem:[#allocation2 + $0x10] sm:$0xff]  ;;  %v293_v50 = vld [vmem:[#allocation2 + $0x8] sm:$0xff]  ;;  %p262_p9 = scmp.lt.s32.totalorder %s999_s20, 3  ;;  %s998_s10 = sshll.u32 %s1623_s9, 6 }
  0x6d   : > { %v300_v48 = vunpack.c.l.bf16 %v292_v46  ;;  %v301_v49 = vunpack.c.h.bf16 %v292_v46  ;;  %v1230_v52 = vld [vmem:[%s1627_s29 + $0x1b0] ss:$8 sps:$4 sm:$0xff]   ;;  %v304_v53 = vunpack.c.l.bf16 %v294_v47  ;;  %v305_v54 = vunpack.c.h.bf16 %v294_v47  ;;  %v1231_v56 = vld [vmem:[%s1627_s29 + $0xc4] ss:$8 sps:$4 sm:$0xff]   ;;  %v1235_v63 = vld [vmem:[%s1627_s29 + $0xc0] ss:$8 sps:$4 sm:$0xff]  }
  0x6e   : > { %741 = vmatpush1.bf16.msra.mxu1 %v1187_v18  ;;  %v295_v55 = vld [vmem:[#allocation2 + $0x18] sm:$0xff]  ;;  %v1233_v57 = vld [vmem:[%s1627_s29 + $0x1c4] ss:$8 sps:$4 sm:$0xff]   ;;  %v302_v58 = vunpack.c.l.bf16 %v293_v50  ;;  %v303_v59 = vunpack.c.h.bf16 %v293_v50  ;;  %v298_v62 = vld [vmem:[#allocation2 + $0x30] sm:$0xff]  ;;  %s1790_s20 = smov (!%p262_p9, %s999_s20), 3  ;;  %s256_s11 = scalar_lea.vmem [#allocation7], %s998_s10 }
  0x6f   : > { %794 = vmatpush1.bf16.msra.mxu0 %v1188_v19  ;;  %742 = vmatprep.subr.bf16.mxu1 %v1189_v20  ;;  %1255 = vtanh.f32 %v300_v48  ;;  %v296_v60 = vld [vmem:[#allocation2 + $0x20] sm:$0xff]  ;;  %v306_v61 = vunpack.c.l.bf16 %v295_v55  ;;  %v307_v1 = vunpack.c.h.bf16 %v295_v55  ;;  %v297_v2 = vld [vmem:[#allocation2 + $0x28] sm:$0xff]  ;;  %v1237_v3 = vld [vmem:[%s1627_s29 + $0xd4] ss:$8 sps:$4 sm:$0xff]   ;;  %v313_v7 = vunpack.c.h.bf16 %v298_v62  ;;  %s264_s18 = scalar_lea.vmem %s1759_s2, %s1790_s20  ;;  %s1070_s21 = sshll.u32 %s1423_s15, 8 }
  0x70   : > { %795 = vmatprep.subr.bf16.mxu0 %v1191_v21  ;;  %1257 = vtanh.f32 %v301_v49  ;;  %v1236_v0 = vld [vmem:[%s1627_s29 + $0x1c0] ss:$8 sps:$4 sm:$0xff]   ;;  %v1239_v4 = vld [vmem:[%s1627_s29 + $0x1d4] ss:$8 sps:$4 sm:$0xff]   ;;  %v309_v5 = vunpack.c.h.bf16 %v296_v60  ;;  %v311_v8 = vunpack.c.h.bf16 %v297_v2  ;;  %v1241_v9 = vld [vmem:[%s1627_s29 + $0xd0] ss:$8 sps:$4 sm:$0xff]   ;;  %v308_v14 = vunpack.c.l.bf16 %v296_v60  ;;  %s1706_s7 = scalar_lea.hbm %s1760_s3, %s1070_s21 }
  0x71   : > { %1259 = vtanh.f32 %v304_v53  ;;  %v299_v6 = vld [vmem:[#allocation2 + $0x38] sm:$0xff]  ;;  %v1243_v12 = vld [vmem:[%s1627_s29 + $0xe4] ss:$8 sps:$4 sm:$0xff]   ;;  %v312_v15 = vunpack.c.l.bf16 %v298_v62  ;;  %v310_v17 = vunpack.c.l.bf16 %v297_v2  ;;  %v1247_v19 = vld [vmem:[%s1627_s29 + $0xe0] ss:$8 sps:$4 sm:$0xff]   ;;  %v274_v48 = vlaneseq  ;;  %s871_s4 = sshll.u32 %s256_s11, 4  ;;  %s1708_s4 = int_to_ptr.vmem [resolvable:$true] %s871_s4 }
  0x72   : > { %743 = vmatpush1.bf16.msra.mxu1 %v1193_v22  ;;  %1261 = vtanh.f32 %v305_v54  ;;  %v1242_v10 = vld [vmem:[%s1627_s29 + $0x1d0] ss:$8 sps:$4 sm:$0xff]   ;;  %v315_v11 = vunpack.c.h.bf16 %v299_v6  ;;  %v1245_v13 = vld [vmem:[%s1627_s29 + $0x1e4] ss:$8 sps:$4 sm:$0xff]   ;;  %v1248_v20 = vld [vmem:[%s1627_s29 + $0x1e0] ss:$8 sps:$4 sm:$0xff]   ;;  %v314_v21 = vunpack.c.l.bf16 %v299_v6 }
  0x73   : > { %796 = vmatpush1.bf16.msra.mxu0 %v1194_v23  ;;  %744 = vmatprep.subr.bf16.mxu1 %v1195_v24  ;;  %1263 = vtanh.f32 %v302_v58  ;;  %v1249_v23 = vld [vmem:[%s1627_s29 + $0xf4] ss:$8 sps:$4 sm:$0xff]   ;;  %v275_v49 = vshrl.u32 %v274_v48, 7  ;;  %s855_s15 = scalar_lea.sflag [#allocation4], %s1623_s9  ;;  %s1345_s26 = scalar_lea.vmem %s1708_s4, 1024 }
  0x74   : > { %797 = vmatprep.subr.bf16.mxu0 %v1197_v25  ;;  %1265 = vtanh.f32 %v303_v59  ;;  %v1251_v24 = vld [vmem:[%s1627_s29 + $0x1f4] ss:$8 sps:$4 sm:$0xff]   ;;  %p1346_p11 = scmp.ne.s32.totalorder %s1708_s4, %s1345_s26  ;;  %p1779_p13 = scmp.ne.s32.totalorder %s1770_s23, 0 }
  0x75   : > { %1267 = vtanh.f32 %v306_v61  ;;  %v276_v50 = vsub.s32 0, %v275_v49  ;;  %s1439_s8 = smov [#allocation7]  }
  0x76   : > { %745 = vmatpush1.bf16.msra.mxu1 %v1199_v26  ;;  %1269 = vtanh.f32 %v307_v1  ;;  %p1347_p4 = pnand %p1346_p11, %p1779_p13  ;;  %s1349_s6 = sshll.u32 %s1439_s8, 4  ;;  %s1350_s6 = int_to_ptr.vmem [resolvable:$false] %s1349_s6 }
  0x77   : > { %798 = vmatpush1.bf16.msra.mxu0 %v1200_v27  ;;  %746 = vmatprep.subr.bf16.mxu1 %v1201_v28  ;;  %1271 = vtanh.f32 %v309_v5  ;;  %s1351_s28 = scalar_lea.vmem %s1350_s6, 2048  ;;  %p1352_p10 = scmp.lt.s32.totalorder %s1708_s4, %s1350_s6 }
  0x78   : > { %799 = vmatprep.subr.bf16.mxu0 %v1203_v29  ;;  %1273 = vtanh.f32 %v313_v7  ;;  %v1253_v29 = vld [vmem:[%s1627_s29 + $0xf0] ss:$8 sps:$4 sm:$0xff]   ;;  %p1348_p1 = pneg %p1347_p4  ;;  %p1353_p3 = scmp.lt.s32.totalorder %s1351_s28, %s1345_s26 }
  0x79   : > { %v1256_v16 = vpop.eup %1255  ;;  %1275 = vtanh.f32 %v311_v8 }
  0x7a   : > { %747 = vmatpush1.bf16.msra.mxu1 %v1205_v30  ;;  %v1258_v18 = vpop.eup %1257  ;;  %1277 = vtanh.f32 %v315_v11  ;;  %v1254_v30 = vld [vmem:[%s1627_s29 + $0x1f0] ss:$8 sps:$4 sm:$0xff]   ;;  %p1354_p6 = por %p1353_p3, %p1352_p10 }
  0x7b   : > { %800 = vmatpush1.bf16.msra.mxu0 %v1206_v31  ;;  %748 = vmatprep.subr.bf16.mxu1 %v1207_v32  ;;  %v1260_v22 = vpop.eup %1259  ;;  %1279 = vtanh.f32 %v308_v14 }
  0x7c   : > { %801 = vmatprep.subr.bf16.mxu0 %v1209_v33  ;;  %v1262_v25 = vpop.eup %1261  ;;  %1281 = vtanh.f32 %v312_v15  ;;  %p1355_p0 = pnand %p1354_p6, %p1348_p1 }
  0x7d   : > { %v1264_v26 = vpop.eup %1263  ;;  %v333_v27 = vpack.c.bf16 %v1262_v25, %v1258_v18  ;;  %1283 = vtanh.f32 %v310_v17 }
  0x7e   : > { %749 = vmatpush1.bf16.msra.mxu1 %v1211_v34  ;;  %v1266_v28 = vpop.eup %1265  ;;  %1285 = vtanh.f32 %v314_v21 }
  0x7f   : > { %802 = vmatpush1.bf16.msra.mxu0 %v1212_v35  ;;  %750 = vmatprep.subr.bf16.mxu1 %v1213_v36  ;;  %v1268_v31 = vpop.eup %1267  ;;  %v332_v35 = vpack.c.bf16 %v1260_v22, %v1256_v16 }
  0x80   : > { %803 = vmatprep.subr.bf16.mxu0 %v1215_v37  ;;  %v1270_v32 = vpop.eup %1269  ;;  %764 = vmatprep.mubr.bf16.mxu1 %v333_v27  ;;  %v334_v36 = vpack.c.bf16 %v1268_v31, %v1264_v26 }
  0x81   : > { %v1272_v33 = vpop.eup %1271  ;;  %v335_v34 = vpack.c.bf16 %v1270_v32, %v1266_v28 }
  0x82   : > { %751 = vmatpush1.bf16.msra.mxu1 %v1217_v38  ;;  %v1274_v37 = vpop.eup %1273 }
  0x83   : > { %804 = vmatpush1.bf16.msra.mxu0 %v1218_v39  ;;  %752 = vmatprep.subr.bf16.mxu1 %v1219_v40  ;;  %v1276_v38 = vpop.eup %1275  ;;  %v337_v39 = vpack.c.bf16 %v1274_v37, %v1272_v33 }
  0x84   : > { %805 = vmatprep.subr.bf16.mxu0 %v1221_v41  ;;  %817 = vmatprep.mubr.bf16.mxu0 %v335_v34  ;;  %v1278_v40 = vpop.eup %1277 }
  0x85   : > { %v1280_v41 = vpop.eup %1279 }
  0x86   : > { %753 = vmatpush1.bf16.msra.mxu1 %v1223_v42  ;;  %v339_v42 = vpack.c.bf16 %v1278_v40, %v1276_v38 }
  0x87   : > { %806 = vmatpush1.bf16.msra.mxu0 %v1224_v43  ;;  %754 = vmatprep.subr.bf16.mxu1 %v1225_v44  ;;  %v1282_v43 = vpop.eup %1281 }
  0x88   : > { %807 = vmatprep.subr.bf16.mxu0 %v1227_v45  ;;  %v1284_v44 = vpop.eup %1283  ;;  %v336_v46 = vpack.c.bf16 %v1282_v43, %v1280_v41 }
  0x89   : > { %v1286_v45 = vpop.eup %1285 }
  0x8a   : > { %755 = vmatpush1.bf16.msra.mxu1 %v1229_v51  ;;  %v338_v47 = vpack.c.bf16 %v1286_v45, %v1284_v44  ;;  %v272_v51 = vld [vmem:[%s264_s18] sm:$0x3] }
  0x8b   : > { %808 = vmatpush1.bf16.msra.mxu0 %v1230_v52  ;;  %756 = vmatprep.subr.bf16.mxu1 %v1231_v56  ;;  %v280_v52 = vsub.s32 1, %v275_v49  ;;  %v277_v53 = vrot.slane %v272_v51, %v276_v50 }
  0x8c   : > { %809 = vmatprep.subr.bf16.mxu0 %v1233_v57 }
  0x8d   : > { %v281_v56 = vrot.slane %v272_v51, %v280_v52 }
  0x8e   : > { %757 = vmatpush1.bf16.msra.mxu1 %v1235_v63 }
  0x8f   : > { %810 = vmatpush1.bf16.msra.mxu0 %v1236_v0  ;;  %758 = vmatprep.subr.bf16.mxu1 %v1237_v3 }
  0x90   : > { %811 = vmatprep.subr.bf16.mxu0 %v1239_v4 }
  0x92   : > { %759 = vmatpush1.bf16.msra.mxu1 %v1241_v9 }
  0x93   : > { %812 = vmatpush1.bf16.msra.mxu0 %v1242_v10  ;;  %760 = vmatprep.subr.bf16.mxu1 %v1243_v12 }
  0x94   : > { %813 = vmatprep.subr.bf16.mxu0 %v1245_v13 }
  0x96   : > { %761 = vmatpush1.bf16.msra.mxu1 %v1247_v19 }
  0x97   : > { %814 = vmatpush1.bf16.msra.mxu0 %v1248_v20  ;;  %762 = vmatprep.subr.bf16.mxu1 %v1249_v23 }
  0x98   : > { %815 = vmatprep.subr.bf16.mxu0 %v1251_v24 }
  0x9a   : > { %763 = vmatpush1.bf16.msra.mxu1 %v1253_v29 }
  0x9b   : > { %816 = vmatpush1.bf16.msra.mxu0 %v1254_v30 }
  0x9d   : > { %765 = vmatmul.mubr.bf16.vlgmr.msra.gmra.mrb[0].mxu1 %v332_v35 }
  0x9e   : > { %818 = vmatmul.mubr.bf16.vlgmr.msra.gmra.mrb[0].mxu0 %v334_v36  ;;  %774 = vmatprep.mubr.bf16.mxu1 %v337_v39 }
  0x9f   : > { %827 = vmatprep.mubr.bf16.mxu0 %v339_v42 }
  0xa5   : > { %775 = vmatmul.mubr.bf16.gmra.mrb[4].mxu1 %v336_v46 }
  0xa6   : > { %828 = vmatmul.mubr.bf16.gmra.mrb[4].mxu0 %v338_v47 }
 0x170   : > { %v766_v54 = vpop.f32.mrb[0].mxu1 }
 0x171   : > { %v819_v55 = vpop.f32.mrb[0].mxu0  ;;  %v768_v58 = vpop.f32.mrb[1].mxu1 }
 0x172   : > { %v820_v57 = vadd.f32 %v819_v55, %v766_v54  ;;  %v821_v59 = vpop.f32.mrb[1].mxu0  ;;  %v770_v61 = vpop.f32.mrb[2].mxu1 }
 0x173   : > { %v822_v60 = vadd.f32 %v821_v59, %v768_v58  ;;  %v823_v62 = vpop.f32.mrb[2].mxu0  ;;  %v772_v1 = vpop.f32.mrb[3].mxu1 }
 0x174   : > { %v838_v63 = vadd.f32 %v820_v57, %v277_v53  ;;  %v824_v0 = vadd.f32 %v823_v62, %v770_v61  ;;  %v825_v2 = vpop.f32.mrb[3].mxu0 }
 0x175   : > { %v839_v3 = vadd.f32 %v822_v60, %v281_v56  ;;  %v826_v4 = vadd.f32 %v825_v2, %v772_v1 }
 0x176   : > { %846 = vst [vmem:[%s256_s11] sm:$0xff] %v838_v63  ;;  %v840_v5 = vadd.f32 %v824_v0, %v277_v53 }
 0x177   : > { %847 = vst [vmem:[%s256_s11 + $0x8] sm:$0xff] %v839_v3  ;;  %v841_v6 = vadd.f32 %v826_v4, %v281_v56 }
 0x178   : > { %848 = vst [vmem:[%s256_s11 + $0x10] sm:$0xff] %v840_v5  ;;  %v776_v7 = vpop.f32.mrb[4].mxu1 }
 0x179   : > { %849 = vst [vmem:[%s256_s11 + $0x18] sm:$0xff] %v841_v6  ;;  %v829_v8 = vpop.f32.mrb[4].mxu0  ;;  %v778_v10 = vpop.f32.mrb[5].mxu1 }
 0x17a   : > { %v830_v9 = vadd.f32 %v829_v8, %v776_v7  ;;  %v831_v11 = vpop.f32.mrb[5].mxu0  ;;  %v780_v13 = vpop.f32.mrb[6].mxu1 }
 0x17b   : > { %v832_v12 = vadd.f32 %v831_v11, %v778_v10  ;;  %v833_v14 = vpop.f32.mrb[6].mxu0  ;;  %v782_v17 = vpop.f32.mrb[7].mxu1 }
 0x17c   : > { %v842_v15 = vadd.f32 %v830_v9, %v277_v53  ;;  %v834_v16 = vadd.f32 %v833_v14, %v780_v13  ;;  %v835_v18 = vpop.f32.mrb[7].mxu0 }
 0x17d   : > { %v843_v19 = vadd.f32 %v832_v12, %v281_v56  ;;  %v836_v20 = vadd.f32 %v835_v18, %v782_v17 }
 0x17e   : > { %850 = vst [vmem:[%s256_s11 + $0x20] sm:$0xff] %v842_v15  ;;  %v844_v21 = vadd.f32 %v834_v16, %v277_v53 }
 0x17f   : > { %851 = vst [vmem:[%s256_s11 + $0x28] sm:$0xff] %v843_v19  ;;  %v845_v22 = vadd.f32 %v836_v20, %v281_v56 }
 0x180   : > { %852 = vst [vmem:[%s256_s11 + $0x30] sm:$0xff] %v844_v21 }
 0x181   : > { %853 = vst [vmem:[%s256_s11 + $0x38] sm:$0xff] %v845_v22 }
 0x182   : > { %1358 = shalt.err (!%p1355_p0)
}
 0x183   : > { %s1359_s29 = scalar_lea.hbm %s1706_s7, 1024  ;;  %s1363_s25 = scalar_lea.hbm %s1760_s3, 2048 }
 0x184   : > { %p1360_p2 = scmp.ne.s32.totalorder %s1706_s7, %s1359_s29  ;;  %p1364_p5 = scmp.lt.u32.totalorder %s1706_s7, %s1760_s3 }
 0x185   : > { %p1365_p8 = scmp.lt.u32.totalorder %s1363_s25, %s1359_s29  ;;  %p1367_p11 = scmp.lt.u32.totalorder %s1359_s29, %s1706_s7 }
 0x186   : > { %p1361_p7 = pnand %p1360_p2, %p1779_p13 }
 0x187   : > { %p1366_p9 = por %p1365_p8, %p1364_p5 }
 0x188   : > { %p1362_p12 = pneg %p1361_p7 }
 0x189   : > { %p1368_p4 = por %p1367_p11, %p1366_p9 }
 0x18b   : > { %p1369_p1 = pnand %p1368_p4, %p1362_p12 }
 0x18d   : > { %1372 = shalt.err (!%p1369_p1)
}
 0x18e   : > { %s1440_s11 = smov 256   ;;  %s1441_s21 = smov 512  }
 0x18f   : > { %s1442_s5 = smov 16  }
 0x190   : > { %1085 = dma.vmem_to_hbm [thread:$0]  (%p1779_p13), %s1708_s4, 1024, %s1706_s7, %s855_s15, %s1440_s11, %s1441_s21, %s1442_s5  }
 0x191 PF: > { %s886_s27 = sand.u32 1, %s1411_s12   ;;  %p1780_p10 = scmp.ne.s32.totalorder %s1771_s24, 0 }
 0x192   : > { %p1781_p3 = scmp.ge.s32.totalorder %s1431_s17, 2  ;;  %s887_s26 = scalar_lea.sflag [#allocation4], %s886_s27 }
 0x194   : > { %p1096_p6 = pnand %p1781_p3, %p1780_p10 }
 0x196   : > { %1406 = dma.done.wait (!%p1096_p6), %s887_s26, 1024  }
 0x197   : > { %1408 = vsyncadd (!%p1096_p6), %s887_s26, 4294966272  ;;  %s20_s17 = sadd.s32 1, %s1431_s17   ;;  %s1782_s12 = smov %s1415_s13 }
 0x198   : > { %p17_p0 = scmp.ge.s32.totalorder %s20_s17, 4   ;;  %s1783_s13 = smov %s1419_s14 }
 0x199   : > { %s1784_s14 = smov %s1583_s19  ;;  %s1785_s15 = smov %s1427_s16 }
 0x19a   : > { %s1786_s16 = smov %s1788_s30  ;;  %19 = sbr.rel (!%p17_p0) target bundleno = 7 (0x7), region = 90 }
 0x1a1   :  { %892 = vsyncpa [#allocation3], 1 }
 0x1a2   :  { %894 = vsyncpa [#allocation3 + $0x1], 1 }
 0x1a3   :  { %895 = vsyncpa [#allocation6], 1 }
 0x1a4   :  { %897 = vsyncpa [#allocation6 + $0x1], 1 }
 0x1a5   :  { %898 = vsyncpa [#allocation4], 1 }
 0x1a6   :  { %900 = vsyncpa [#allocation4 + $0x1], 1 }

</bundles_post_ra>
